<compile_context>
chip_gen: v7x
topology: tpu7x:2x2x1
jax: 0.10.0
libtpu: 0.0.40
codegen_flags: <defaults>
</compile_context>

<pallas_src>
import functools

import jax
import jax.numpy as jnp
from jax import lax
from jax.experimental import pallas as pl
from jax.experimental.pallas import tpu as pltpu

_VMEM_LIMIT_BYTES = 48 * 1024 * 1024    # <= v7x 64 MiB physical; fine on v5e/v6e
_VMEM_BUDGET_BYTES = 24 * 1024 * 1024   # what the tile picker plans against
_SINGLE_PASS_BYTES = 2 * 1024 * 1024    # (C, HW) slab size below which x stays resident


def _attention_matrix(gram, beta):
    """beta * softmax(rowmax(gram) - gram, axis=-1), all in f32."""
    # attention_new = rowmax - gram; its numerically-stable softmax numerator
    # is exp(rowmin - gram) (the rowmax cancels), so rowmax is never needed.
    row_min = jnp.min(gram, axis=-1, keepdims=True)
    e = jnp.exp(row_min - gram)
    denom = jnp.sum(e, axis=-1, keepdims=True)
    return (beta * e) / denom


def _cam_single_pass_kernel(beta_ref, x_ref, o_ref):
    xt = x_ref[0]                                               # (C, HWp)
    gram = lax.dot_general(xt, xt, (((1,), (1,)), ((), ())),
                           preferred_element_type=jnp.float32)   # (C, C) f32
    pmat = _attention_matrix(gram, beta_ref[0]).astype(xt.dtype)
    feat_e = lax.dot_general(pmat, xt, (((1,), (0,)), ((), ())),
                             preferred_element_type=jnp.float32)
    o_ref[0] = (feat_e + xt.astype(jnp.float32)).astype(o_ref.dtype)


def _cam_tiled_kernel(beta_ref, x_ref, o_ref, acc_ref, pmat_ref):
    p = pl.program_id(1)                 # 0 = gram accumulate, 1 = apply
    k = pl.program_id(2)                 # HW-tile index
    k_last = pl.num_programs(2) - 1
    xt = x_ref[0]                        # (C, tile_hw), native dtype

    @pl.when(jnp.logical_and(p == 0, k == 0))
    def _init():
        acc_ref[...] = jnp.zeros_like(acc_ref)
        # The output window is pinned to block (b, :, 0) throughout phase 0;
        # seed it with the residual so it never holds uninitialized data
        # (phase 1, k == 0 overwrites it with the final value).
        o_ref[0] = xt

    @pl.when(p == 0)
    def _accumulate():
        # gram += x_tile @ x_tile^T, contracting the lane (HW) axis directly:
        # no transpose of the (C, tile_hw) slab, f32 accumulation on the MXU.
        acc_ref[...] += lax.dot_general(xt, xt, (((1,), (1,)), ((), ())),
                                        preferred_element_type=jnp.float32)

    @pl.when(jnp.logical_and(p == 0, k == k_last))
    def _finalize():
        # One-time softmax + beta scale + cast into x's dtype (hoisted out of
        # every phase-1 step).
        pmat_ref[...] = _attention_matrix(acc_ref[...],
                                          beta_ref[0]).astype(pmat_ref.dtype)

    @pl.when(p == 1)
    def _apply():
        feat_e = lax.dot_general(pmat_ref[...], xt, (((1,), (0,)), ((), ())),
                                 preferred_element_type=jnp.float32)
        o_ref[0] = (feat_e + xt.astype(jnp.float32)).astype(o_ref.dtype)


def _pick_tile_hw(hw, c, itemsize):
    """Largest lane-dense HW tile (multiple of 128, preferring 512) so that
    2x input + 2x output double-buffers plus the two (C, C) scratches stay
    within the VMEM budget."""
    hw128 = (hw + 127) // 128 * 128
    fixed = (4 + itemsize) * c * c                       # f32 acc + pmat scratch
    slab_budget = max(128 * c * itemsize, (_VMEM_BUDGET_BYTES - fixed) // 4)
    cap = max(128, (slab_budget // (c * itemsize)) // 128 * 128)
    tile = min(cap, hw128, 2048)
    if tile >= 512:
        tile = tile // 512 * 512                         # MXU-friendly contraction dim
    return tile


@functools.partial(jax.jit, static_argnames=("tile_hw", "force_tiled"))
def channel_attention(x, beta, *, tile_hw=None, force_tiled=False):
    """ChannelAttentionModule.forward: beta * softmax(max(G)-G) @ x_flat + x."""
    B, C, H, W = x.shape
    HW = H * W
    itemsize = jnp.dtype(x.dtype).itemsize
    xf = x.reshape(B, C, HW)
    beta1 = jnp.asarray(beta, jnp.float32).reshape((1,))

    hw128 = (HW + 127) // 128 * 128
    single_pass = (not force_tiled and tile_hw is None
                   and C * hw128 * itemsize <= _SINGLE_PASS_BYTES)

    if single_pass:
        tile = hw128
    else:
        tile = tile_hw if tile_hw is not None else _pick_tile_hw(HW, C, itemsize)
        assert tile % 128 == 0
    hwp = (HW + tile - 1) // tile * tile
    if hwp != HW:
        # Zero columns contribute nothing to the gram or the apply matmul.
        xf = jnp.pad(xf, ((0, 0), (0, 0), (0, hwp - HW)))

    if single_pass:
        out = pl.pallas_call(
            _cam_single_pass_kernel,
            out_shape=jax.ShapeDtypeStruct((B, C, hwp), x.dtype),
            grid_spec=pltpu.PrefetchScalarGridSpec(
                num_scalar_prefetch=0,
                grid=(B,),
                in_specs=[
                    pl.BlockSpec(memory_space=pltpu.MemorySpace.SMEM),
                    pl.BlockSpec((1, C, hwp), lambda b: (b, 0, 0)),
                ],
                out_specs=pl.BlockSpec((1, C, hwp), lambda b: (b, 0, 0)),
            ),
            compiler_params=pltpu.CompilerParams(
                dimension_semantics=("parallel",),
                vmem_limit_bytes=_VMEM_LIMIT_BYTES),
        )(beta1, xf)
    else:
        K = hwp // tile
        out = pl.pallas_call(
            _cam_tiled_kernel,
            out_shape=jax.ShapeDtypeStruct((B, C, hwp), x.dtype),
            grid_spec=pltpu.PrefetchScalarGridSpec(
                num_scalar_prefetch=0,
                grid=(B, 2, K),
                in_specs=[
                    pl.BlockSpec(memory_space=pltpu.MemorySpace.SMEM),
                    # lane-dense (C, tile) slab of x; fetched in both phases.
                    pl.BlockSpec((1, C, tile), lambda b, p, k: (b, 0, k)),
                ],
                # phase 0 pins the output window to block (b, 0) (seeded with
                # the residual); phase 1 writes every tile.
                out_specs=pl.BlockSpec((1, C, tile),
                                       lambda b, p, k: (b, 0, k * p)),
                scratch_shapes=[pltpu.VMEM((C, C), jnp.float32),
                                pltpu.VMEM((C, C), x.dtype)],
            ),
            compiler_params=pltpu.CompilerParams(
                dimension_semantics=("parallel", "arbitrary", "arbitrary"),
                vmem_limit_bytes=_VMEM_LIMIT_BYTES),
        )(beta1, xf)

    if hwp != HW:
        out = out[:, :, :HW]
    return out.reshape(B, C, H, W)


def channel_attention_ref(x, beta):
    B, C, H, W = x.shape
    feat_a = x.reshape(B, C, H * W).astype(jnp.float32)
    attn = jnp.einsum("bcn,bdn->bcd", feat_a, feat_a,
                      precision=lax.Precision.HIGHEST)
    attn_new = jnp.max(attn, axis=-1, keepdims=True) - attn
    attn = jax.nn.softmax(attn_new, axis=-1)
    feat_e = jnp.einsum("bcd,bdn->bcn", attn, feat_a,
                        precision=lax.Precision.HIGHEST)
    out = beta * feat_e + feat_a
    return out.reshape(B, C, H, W).astype(x.dtype)


if __name__ == "__main__":
    key = jax.random.PRNGKey(0)
    k1, k2 = jax.random.split(key)

    # Small stand-in shapes for the CAM that sits inside every TOFR block.
    B, C, H, W = 2, 8, 16, 16
    x = 0.1 * jax.random.normal(k1, (B, C, H, W), dtype=jnp.float32)

    # Parameter init exactly as in the module: beta = torch.zeros(1).
    beta0 = jnp.zeros((1,), dtype=jnp.float32)
    out0 = jax.block_until_ready(channel_attention(x, beta0))
    assert out0.shape == (B, C, H, W)
    assert jnp.allclose(out0, channel_attention_ref(x, beta0),
                        atol=1e-5, rtol=1e-5)

    # Non-trivial beta exercises the full attention math (single-pass path).
    beta = jnp.full((1,), 0.5, dtype=jnp.float32)
    ref = channel_attention_ref(x, beta)
    out = jax.block_until_ready(channel_attention(x, beta))
    assert jnp.allclose(out, ref, atol=2e-3, rtol=2e-3)

    # Force the two-phase tiled path (K = 2 gram-accumulation tiles).
    out_tiled = jax.block_until_ready(channel_attention(x, beta, tile_hw=128))
    assert jnp.allclose(out_tiled, ref, atol=2e-3, rtol=2e-3)

    # Spatial size whose HW is not a multiple of 128 -> zero-padded lanes,
    # exercised on both the single-pass and the tiled path.
    x2 = 0.1 * jax.random.normal(k2, (1, C, 12, 12), dtype=jnp.float32)
    ref2 = channel_attention_ref(x2, beta)
    out2 = jax.block_until_ready(channel_attention(x2, beta))
    assert jnp.allclose(out2, ref2, atol=2e-3, rtol=2e-3)
    out2t = jax.block_until_ready(channel_attention(x2, beta, tile_hw=128))
    assert jnp.allclose(out2t, ref2, atol=2e-3, rtol=2e-3)

    print("KERNEL_OK")
</pallas_src>

<mosaic_0001>
module attributes {stable_mosaic.version = 11 : i64} {
  func.func @_cam_single_pass_kernel(%arg0: i32, %arg1: memref<1xf32, #tpu.memory_space<smem>>, %arg2: memref<1x8x256xf32, #tpu.memory_space<vmem>>, %arg3: memref<1x8x256xf32, #tpu.memory_space<vmem>>) attributes {dimension_semantics = [#tpu.dimension_semantics<parallel>], iteration_bounds = array<i64: 2>, scalar_prefetch = 0 : i64, scratch_operands = 0 : i64, tpu.core_type = #tpu.core_type<tc>, window_params = [{transform_indices = @transform_0, window_bounds = array<i64: 1>}, {transform_indices = @transform_1, window_bounds = array<i64: 1, 8, 256>}, {transform_indices = @transform_2, window_bounds = array<i64: 1, 8, 256>}]} {
    %c0 = arith.constant 0 : index
    %c0_0 = arith.constant 0 : index
    %c0_1 = arith.constant 0 : index
    %0 = vector.load %arg2[%c0, %c0_0, %c0_1] : memref<1x8x256xf32, #tpu.memory_space<vmem>>, vector<1x8x256xf32>
    %1 = vector.shape_cast %0 : vector<1x8x256xf32> to vector<8x256xf32>
    %cst = arith.constant dense<0.000000e+00> : vector<8x8xf32>
    %2 = tpu.matmul %1, %1, %cst {dimension_numbers = #tpu.dot_dimension_numbers<[1], [1], [0], [0], [0, 0, 1, 0], [], []>} : vector<8x256xf32>, vector<8x256xf32>, vector<8x8xf32> -> vector<8x8xf32>
    %c0_2 = arith.constant 0 : index
    %3 = memref.load %arg1[%c0_2] : memref<1xf32, #tpu.memory_space<smem>>
    %cst_3 = arith.constant dense<0x7F800000> : vector<8xf32>
    %4 = vector.multi_reduction <minimumf>, %2, %cst_3 [1] : vector<8x8xf32> to vector<8xf32>
    %5 = vector.shape_cast %4 : vector<8xf32> to vector<8x1xf32>
    %6 = vector.broadcast %5 : vector<8x1xf32> to vector<8x8xf32>
    %7 = arith.subf %6, %2 : vector<8x8xf32>
    %8 = math.exp %7 : vector<8x8xf32>
    %cst_4 = arith.constant dense<0.000000e+00> : vector<8xf32>
    %9 = vector.multi_reduction <add>, %8, %cst_4 [1] : vector<8x8xf32> to vector<8xf32>
    %10 = vector.shape_cast %9 : vector<8xf32> to vector<8x1xf32>
    %11 = vector.broadcast %3 : f32 to vector<8x8xf32>
    %12 = arith.mulf %11, %8 : vector<8x8xf32>
    %13 = vector.broadcast %10 : vector<8x1xf32> to vector<8x8xf32>
    %14 = arith.divf %12, %13 : vector<8x8xf32>
    %cst_5 = arith.constant dense<0.000000e+00> : vector<8x256xf32>
    %15 = tpu.matmul %14, %1, %cst_5 {dimension_numbers = #tpu.dot_dimension_numbers<[1], [0], [0], [1], [0, 0, 1, 1], [], []>} : vector<8x8xf32>, vector<8x256xf32>, vector<8x256xf32> -> vector<8x256xf32>
    %16 = arith.addf %15, %1 : vector<8x256xf32>
    %c0_6 = arith.constant 0 : index
    %c0_7 = arith.constant 0 : index
    %c0_8 = arith.constant 0 : index
    %17 = vector.load %arg3[%c0_6, %c0_7, %c0_8] : memref<1x8x256xf32, #tpu.memory_space<vmem>>, vector<1x8x256xf32>
    %18 = vector.shape_cast %17 : vector<1x8x256xf32> to vector<8x256xf32>
    %19 = vector.shape_cast %16 : vector<8x256xf32> to vector<1x8x256xf32>
    tpu.vector_store %arg3[%c0_6, %c0_7, %c0_8], %19 {strides = array<i32>} : memref<1x8x256xf32, #tpu.memory_space<vmem>>, vector<1x8x256xf32>,
    return
  }
  func.func @transform_0(%arg0: i32) -> i32 {
    %c0_i32 = arith.constant 0 : i32
    %c0_i32_0 = arith.constant 0 : i32
    return %c0_i32 : i32
  }
  func.func @transform_1(%arg0: i32) -> (i32, i32, i32) {
    %c0_i32 = arith.constant 0 : i32
    %c0_i32_0 = arith.constant 0 : i32
    %c0_i32_1 = arith.constant 0 : i32
    return %arg0, %c0_i32, %c0_i32_0 : i32, i32, i32
  }
  func.func @transform_2(%arg0: i32) -> (i32, i32, i32) {
    %c0_i32 = arith.constant 0 : i32
    %c0_i32_0 = arith.constant 0 : i32
    %c0_i32_1 = arith.constant 0 : i32
    return %arg0, %c0_i32, %c0_i32_0 : i32, i32, i32
  }
}

</mosaic_0001>

<bundles_post_ra>
// kernel: channel_attention.1
= control target key start
LH: loop header
LB: loop body
LE: loop exit
PB: predicated region body
PF: predicated region fallthrough
CT: control target
= control target key end

     0   :  { %s417_s11 = smov 0   ;;  %s444_s0 = inlined_call_operand.<no memory space> [shape: f32[1], index: 0, kind: input, shape index: {}]   ;;  %s445_s1 = inlined_call_operand.vmem [shape: f32[2,8,256], index: 1, kind: input, shape index: {}]   ;;  %s446_s2 = inlined_call_operand.vmem [shape: f32[2,8,256], index: 2, kind: output, shape index: {}]  }
   0x1   :  { %7 = sst [smem:[#allocation2]] %s444_s0 }
   0x2 LB: > { %s363_s12 = sadd.s32 4294967295, %s396_s11   ;;  %p367_p0 = scmp.ge.s32.totalorder %s396_s11, 1  ;;  %s396_s11 = sphi %s417_s11, %s13_s11  }
   0x3   : > { %p113_p1 = scmp.lt.s32.totalorder %s396_s11, 3 }
   0x5   : > { %p114_p2 = pnand %p367_p0, %p113_p1 }
   0x6   : > { %p135_p3 = scmp.lt.s32.totalorder (!%p114_p2), %s363_s12, 1  ;;  %vm218_vm0 = vcmask (!%p114_p2), 64512   ;;  %v398_v10 = vmov (!%p114_p2), 0.0   ;;  %s217_s16 = sld [smem:[#allocation2]] (!%p114_p2) }
   0x7   : > { %117 = sbr.rel (%p114_p2) target bundleno = 764 (0x2fc), region = 28  ;;  %299 = vmatprep.mubr.f32.mxu1 (!%p114_p2), %v398_v10 }
   0xc   : > { %v228_v12 = vstv (!%p114_p2), %s217_s16 }
   0xe   : > { %s448_s12 = smov (!%p135_p3, %s363_s12), 1 }
   0xf   : > { %s375_s0 = sshll.u32 %s448_s12, 4 }
  0x10   : > { %s139_s15 = scalar_lea.vmem %s445_s1, %s375_s0  ;;  %s144_s19 = scalar_lea.vmem %s446_s2, %s375_s0 }
  0x11   : > { %v146_v0 = vld [vmem:[%s139_s15 + $0x8] sm:$0xff]  ;;  %v145_v1 = vld [vmem:[%s139_s15] sm:$0xff] }
  0x12   : > { %147 = vmatprep.subr.mxu0 %v146_v0  ;;  %211 = vmatprep.mubr.f32.mxu0 %v146_v0 }
  0x13   : > { %148 = vmatpush1.xpose.msra.mxu0 %v145_v1  ;;  %235 = vmatprep.subr.mxu1 %v146_v0 }
  0x14   : > { %236 = vmatpush1.msra.mxu1 %v145_v1 }
  0x16   : > { %212 = vmatmul.mubr.f32.vlgmr.msra.gmra.mrb[0].mxu0 %v145_v1 }
  0xe9   : > { %v213_v2 = vpop.f32.mrb[0].mxu0 }
  0xea   : > { %v215_v3 = vpop.f32.mrb[1].mxu0  ;;  %v219_v4 = vsel %vm218_vm0, %v213_v2, inf }
  0xeb   : > { %220 = vmin.xlane.f32.xlu0 %v219_v4 }
 0x178   : > { %v221_v5 = vpop.xlane.xlu0 %220 }
 0x179   : > { %v222_v6 = vsub.f32 %v221_v5, %v213_v2 }
 0x17b   : > { %v223_v7 = vmul.f32 1.442695, %v222_v6 }
 0x17d   : > { %386 = vpow2.f32 %v223_v7 }
 0x187   : > { %v387_v8 = vpop.eup %386 }
 0x188   : > { %v225_v9 = vsel %vm218_vm0, %v387_v8, 0.0  ;;  %v229_v13 = vmul.f32 %v387_v8, %v228_v12 }
 0x189   : > { %226 = vadd.xlane.f32.xlu0 %v225_v9 }
 0x216   : > { %v227_v11 = vpop.xlane.xlu0 %226 }
 0x217   : > { %388 = vrcp.f32 %v227_v11 }
 0x221   : > { %v389_v14 = vpop.eup %388 }
 0x222   : > { %v231_v15 = vmul.f32 %v389_v14, %v229_v13 }
 0x224   : > { %372 = vmatmul.mubr.msk.f32.vlgmr.msra.gmra.mrb[0].mxu1 %vm218_vm0, %v231_v15 }
 0x2f7   : > { %v301_v16 = vpop.f32.mrb[0].mxu1 }
 0x2f8   : > { %v302_v17 = vadd.f32 %v301_v16, %v145_v1  ;;  %v303_v18 = vpop.f32.mrb[1].mxu1 }
 0x2f9   : > { %v304_v19 = vadd.f32 %v303_v18, %v146_v0 }
 0x2fa   : > { %306 = vst [vmem:[%s144_s19] sm:$0xff] %v302_v17 }
 0x2fb   : > { %307 = vst [vmem:[%s144_s19 + $0x8] sm:$0xff] %v304_v19 }
 0x2fc PF: > { %s13_s11 = sadd.s32 1, %s396_s11  }
 0x2fd   : > { %p10_p4 = scmp.ge.s32.totalorder %s13_s11, 4  }
 0x2ff   :  { %12 = sbr.rel (!%p10_p4) target bundleno = 2 (0x2), region = 58 }

</bundles_post_ra>
